<compile_context>
chip_gen: v5e
topology: v5e:2x2
jax: 0.10.0
libtpu: 0.0.40
codegen_flags: <defaults>
</compile_context>

<pallas_src>
import functools

import jax
import jax.numpy as jnp
import numpy as np
from jax.experimental import pallas as pl
from jax.experimental.pallas import tpu as pltpu


def _mha_kernel(q_ref, k_ref, v_ref, bias_ref,
                wq_ref, wk_ref, wv_ref, wr_ref,
                o_ref, *, head_count, dk_head, dv_head):
    bb, l_q, d_q = q_ref.shape
    _, l_kv, d_k = k_ref.shape
    d_v = v_ref.shape[-1]
    H = head_count
    bf16, f32 = jnp.bfloat16, jnp.float32

    # ---- projections: batch folded into the sublane (row) axis, one MXU pass each
    q2 = q_ref[...].reshape(bb * l_q, d_q).astype(bf16)
    k2 = k_ref[...].reshape(bb * l_kv, d_k).astype(bf16)
    v2 = v_ref[...].reshape(bb * l_kv, d_v).astype(bf16)

    # 1/sqrt(dk) is already folded into wq by the wrapper.
    q_proj = jnp.dot(q2, wq_ref[...].astype(bf16), preferred_element_type=f32)
    k_proj = jnp.dot(k2, wk_ref[...].astype(bf16), preferred_element_type=f32)
    v_proj = jnp.dot(v2, wv_ref[...].astype(bf16), preferred_element_type=f32)

    # ---- one-time head-major relayout: (bb*l, H*dh) -> (H*bb, l, dh) ----------
    # The relayout is paid once per tensor (not once per head inside the
    # attention math) and its outputs feed full-width batched MXU ops.
    def split_heads(p, l, dh):
        p3 = p.reshape(bb, l, H * dh)
        heads = jnp.stack([p3[:, :, h * dh:(h + 1) * dh] for h in range(H)],
                          axis=0)                       # (H, bb, l, dh)
        return heads.reshape(H * bb, l, dh).astype(bf16)

    qh = split_heads(q_proj, l_q, dk_head)              # (H*bb, l_q,  dk)
    kh = split_heads(k_proj, l_kv, dk_head)             # (H*bb, l_kv, dk)
    vh = split_heads(v_proj, l_kv, dv_head)             # (H*bb, l_kv, dv)

    # ---- batched attention over the fused (head, batch) axis ------------------
    # TODO(synk): for production l_q/l_kv add a kv-tile grid axis with online
    # softmax so s/e/w never materialize at (H*bb, l_q, l_kv) (v7x 64 MiB VMEM).
    s = jnp.einsum('bqd,bkd->bqk', qh, kh,
                   preferred_element_type=f32)           # (H*bb, l_q, l_kv) f32
    # additive mask bias, broadcast across heads without materializing H copies
    s = (s.reshape(H, bb, l_q, l_kv) + bias_ref[...][None]).reshape(H * bb, l_q, l_kv)

    m = jnp.max(s, axis=-1, keepdims=True)
    e = jnp.exp(s - m)
    denom = jnp.sum(e, axis=-1, keepdims=True)
    w = (e * pl.reciprocal(denom, approx=True)).astype(bf16)

    ctx = jnp.einsum('bqk,bkd->bqd', w, vh,
                     preferred_element_type=f32)         # (H*bb, l_q, dv) f32

    # ---- recombine: concat heads back on the lane axis once, single MXU matmul
    ctx4 = ctx.reshape(H, bb, l_q, dv_head)
    ctx_cat = jnp.concatenate([ctx4[h] for h in range(H)], axis=-1)  # (bb, l_q, H*dv)
    ctx2 = ctx_cat.reshape(bb * l_q, H * dv_head).astype(bf16)
    o_ref[...] = jnp.dot(ctx2, wr_ref[...].astype(bf16),
                         preferred_element_type=f32)     # (bb*l_q, d_out) f32


def mha_v1_pallas(queries, keys, values, mask, wq, wk, wv, wr,
                  *, head_count, dk_head, dv_head, batch_block=None):
    B, l_q, d_q = queries.shape
    _, l_kv, d_k = keys.shape
    _, _, d_v = values.shape
    d_out = wr.shape[1]

    # Single grid step by default (batch_block = B): v5e/v6e are single-TC so a
    # grid split only adds per-step overhead; split only for v7x's two cores and
    # only when each step carries enough work (roughly batch_block*l_q >= 256).
    if batch_block is None:
        batch_block = B
    assert B % batch_block == 0
    nb = B // batch_block

    # Fold the 1/sqrt(dk) scale into the query projection weight (free, once).
    wq_scaled = (wq * jnp.float32(dk_head) ** -0.5).astype(jnp.float32)

    # Additive mask bias precomputed in the wrapper (nonzero mask => masked).
    # Finite -1e30 instead of -inf so fully-masked rows stay finite, not NaN.
    if mask is None:
        bias = jnp.zeros((B, l_q, l_kv), jnp.float32)
    else:
        if mask.ndim == queries.ndim - 1:     # (..., l_kv) -> broadcast over l_q
            mask = mask[..., None, :]
        bias = jnp.where(mask != 0, jnp.float32(-1e30), jnp.float32(0.0))
        bias = jnp.broadcast_to(bias, (B, l_q, l_kv)).astype(jnp.float32)

    kernel = functools.partial(_mha_kernel, head_count=head_count,
                               dk_head=dk_head, dv_head=dv_head)

    grid_spec = pltpu.PrefetchScalarGridSpec(
        num_scalar_prefetch=0,
        grid=(nb,),
        in_specs=[
            pl.BlockSpec((batch_block, l_q, d_q), lambda b: (b, 0, 0)),
            pl.BlockSpec((batch_block, l_kv, d_k), lambda b: (b, 0, 0)),
            pl.BlockSpec((batch_block, l_kv, d_v), lambda b: (b, 0, 0)),
            pl.BlockSpec((batch_block, l_q, l_kv), lambda b: (b, 0, 0)),
            # Weights are grid-invariant.  (For very large d_model on v7x,
            # pipeline_mode=pl.Buffered(1) would halve their VMEM footprint.)
            pl.BlockSpec(wq_scaled.shape, lambda b: (0, 0)),
            pl.BlockSpec(wk.shape, lambda b: (0, 0)),
            pl.BlockSpec(wv.shape, lambda b: (0, 0)),
            pl.BlockSpec(wr.shape, lambda b: (0, 0)),
        ],
        # 2-D output slab (rows = batch*l_q): the recombine matmul result is
        # stored directly; the wrapper-side reshape back to 3-D is free.
        out_specs=pl.BlockSpec((batch_block * l_q, d_out), lambda b: (b, 0)),
    )

    out2d = pl.pallas_call(
        kernel,
        out_shape=jax.ShapeDtypeStruct((B * l_q, d_out), jnp.float32),
        grid_spec=grid_spec,
        compiler_params=pltpu.CompilerParams(
            dimension_semantics=("parallel",)),
    )(queries, keys, values, bias, wq_scaled, wk, wv, wr)

    return out2d.reshape(B, l_q, d_out)


def mha_v1_ref(queries, keys, values, mask, wq, wk, wv, wr,
               *, head_count, dk_head, dv_head):
    """Pure-JAX f32 reference replicating the PyTorch forward semantics."""
    q_proj = queries @ wq
    k_proj = keys @ wk
    v_proj = values @ wv
    outs = []
    for h in range(head_count):
        qh = q_proj[..., h * dk_head:(h + 1) * dk_head]
        kh = k_proj[..., h * dk_head:(h + 1) * dk_head]
        vh = v_proj[..., h * dv_head:(h + 1) * dv_head]
        s = jnp.einsum('bqd,bkd->bqk', qh, kh) * (dk_head ** -0.5)
        s = jnp.where(mask != 0, -jnp.inf, s)
        w = jax.nn.softmax(s, axis=-1)
        outs.append(jnp.einsum('bqk,bkd->bqd', w, vh))
    return jnp.concatenate(outs, axis=-1) @ wr


if __name__ == "__main__":
    # Module hyperparameters (mirrors _MHA_V1.__init__ defaults):
    head_count = 4
    query_size = 32
    key_size = 32            # defaults to query_size
    value_size = 32          # defaults to key_size
    dk_head = key_size // head_count     # key_size_per_head = 8
    dv_head = value_size // head_count   # value_size_per_head = 8

    B, l_q, l_kv = 2, 8, 8

    key = jax.random.PRNGKey(0)
    kq, kk, kv, kwq, kwk, kwv, kwr, km = jax.random.split(key, 8)

    queries = jax.random.normal(kq, (B, l_q, query_size), dtype=jnp.float32)
    keys_in = jax.random.normal(kk, (B, l_kv, key_size), dtype=jnp.float32)
    values_in = jax.random.normal(kv, (B, l_kv, value_size), dtype=jnp.float32)

    # Linear weights (bias=False), stored as (in_features, out_features),
    # i.e. the transpose of torch's nn.Linear.weight.
    wq = 0.1 * jax.random.normal(kwq, (query_size, head_count * dk_head), dtype=jnp.float32)
    wk = 0.1 * jax.random.normal(kwk, (key_size, head_count * dk_head), dtype=jnp.float32)
    wv = 0.1 * jax.random.normal(kwv, (value_size, head_count * dv_head), dtype=jnp.float32)
    wr = 0.1 * jax.random.normal(kwr, (head_count * dv_head, value_size), dtype=jnp.float32)

    # uint8-style mask: nonzero => position masked out (-inf pre-softmax in torch).
    # Keep at least one unmasked key per query row (avoids NaN rows in the ref).
    mask_bool = jax.random.bernoulli(km, p=0.25, shape=(B, l_q, l_kv))
    mask_bool = mask_bool.at[..., 0].set(False)
    mask = mask_bool.astype(jnp.int8)

    out = mha_v1_pallas(queries, keys_in, values_in, mask, wq, wk, wv, wr,
                        head_count=head_count, dk_head=dk_head, dv_head=dv_head)
    out = jax.block_until_ready(out)

    ref = mha_v1_ref(queries, keys_in, values_in, mask, wq, wk, wv, wr,
                     head_count=head_count, dk_head=dk_head, dv_head=dv_head)
    # bf16 MXU operands (f32 accumulation) + approx reciprocal -> relaxed
    # tolerance vs. the pure-f32 reference.
    np.testing.assert_allclose(np.asarray(out), np.asarray(ref), rtol=3e-2, atol=3e-2)

    print("KERNEL_OK")
</pallas_src>

<mosaic_0001>
module attributes {stable_mosaic.version = 11 : i64} {
  func.func @_mha_kernel(%arg0: i32, %arg1: memref<2x8x32xf32, #tpu.memory_space<vmem>>, %arg2: memref<2x8x32xf32, #tpu.memory_space<vmem>>, %arg3: memref<2x8x32xf32, #tpu.memory_space<vmem>>, %arg4: memref<2x8x8xf32, #tpu.memory_space<vmem>>, %arg5: memref<32x32xf32, #tpu.memory_space<vmem>>, %arg6: memref<32x32xf32, #tpu.memory_space<vmem>>, %arg7: memref<32x32xf32, #tpu.memory_space<vmem>>, %arg8: memref<32x32xf32, #tpu.memory_space<vmem>>, %arg9: memref<16x32xf32, #tpu.memory_space<vmem>>) attributes {dimension_semantics = [#tpu.dimension_semantics<parallel>], iteration_bounds = array<i64: 1>, scalar_prefetch = 0 : i64, scratch_operands = 0 : i64, tpu.core_type = #tpu.core_type<tc>, window_params = [{transform_indices = @transform_0, window_bounds = array<i64: 2, 8, 32>}, {transform_indices = @transform_1, window_bounds = array<i64: 2, 8, 32>}, {transform_indices = @transform_2, window_bounds = array<i64: 2, 8, 32>}, {transform_indices = @transform_3, window_bounds = array<i64: 2, 8, 8>}, {pipeline_mode = #tpu.pipeline_mode<synchronous>, transform_indices = @transform_4, window_bounds = array<i64: 32, 32>}, {pipeline_mode = #tpu.pipeline_mode<synchronous>, transform_indices = @transform_5, window_bounds = array<i64: 32, 32>}, {pipeline_mode = #tpu.pipeline_mode<synchronous>, transform_indices = @transform_6, window_bounds = array<i64: 32, 32>}, {pipeline_mode = #tpu.pipeline_mode<synchronous>, transform_indices = @transform_7, window_bounds = array<i64: 32, 32>}, {transform_indices = @transform_8, window_bounds = array<i64: 16, 32>}]} {
    %c0 = arith.constant 0 : index
    %c0_0 = arith.constant 0 : index
    %c0_1 = arith.constant 0 : index
    %0 = vector.load %arg1[%c0, %c0_0, %c0_1] : memref<2x8x32xf32, #tpu.memory_space<vmem>>, vector<2x8x32xf32>
    %1 = vector.shape_cast %0 : vector<2x8x32xf32> to vector<16x32xf32>
    %2 = arith.truncf %1 : vector<16x32xf32> to vector<16x32xbf16>
    %c0_2 = arith.constant 0 : index
    %c0_3 = arith.constant 0 : index
    %c0_4 = arith.constant 0 : index
    %3 = vector.load %arg2[%c0_2, %c0_3, %c0_4] : memref<2x8x32xf32, #tpu.memory_space<vmem>>, vector<2x8x32xf32>
    %4 = vector.shape_cast %3 : vector<2x8x32xf32> to vector<16x32xf32>
    %5 = arith.truncf %4 : vector<16x32xf32> to vector<16x32xbf16>
    %c0_5 = arith.constant 0 : index
    %c0_6 = arith.constant 0 : index
    %c0_7 = arith.constant 0 : index
    %6 = vector.load %arg3[%c0_5, %c0_6, %c0_7] : memref<2x8x32xf32, #tpu.memory_space<vmem>>, vector<2x8x32xf32>
    %7 = vector.shape_cast %6 : vector<2x8x32xf32> to vector<16x32xf32>
    %8 = arith.truncf %7 : vector<16x32xf32> to vector<16x32xbf16>
    %c0_8 = arith.constant 0 : index
    %c0_9 = arith.constant 0 : index
    %9 = vector.load %arg5[%c0_8, %c0_9] : memref<32x32xf32, #tpu.memory_space<vmem>>, vector<32x32xf32>
    %10 = arith.truncf %9 : vector<32x32xf32> to vector<32x32xbf16>
    %cst = arith.constant dense<0.000000e+00> : vector<16x32xf32>
    %11 = tpu.matmul %2, %10, %cst {dimension_numbers = #tpu.dot_dimension_numbers<[1], [0], [0], [1], [0, 0, 1, 1], [], []>} : vector<16x32xbf16>, vector<32x32xbf16>, vector<16x32xf32> -> vector<16x32xf32>
    %c0_10 = arith.constant 0 : index
    %c0_11 = arith.constant 0 : index
    %12 = vector.load %arg6[%c0_10, %c0_11] : memref<32x32xf32, #tpu.memory_space<vmem>>, vector<32x32xf32>
    %13 = arith.truncf %12 : vector<32x32xf32> to vector<32x32xbf16>
    %cst_12 = arith.constant dense<0.000000e+00> : vector<16x32xf32>
    %14 = tpu.matmul %5, %13, %cst_12 {dimension_numbers = #tpu.dot_dimension_numbers<[1], [0], [0], [1], [0, 0, 1, 1], [], []>} : vector<16x32xbf16>, vector<32x32xbf16>, vector<16x32xf32> -> vector<16x32xf32>
    %c0_13 = arith.constant 0 : index
    %c0_14 = arith.constant 0 : index
    %15 = vector.load %arg7[%c0_13, %c0_14] : memref<32x32xf32, #tpu.memory_space<vmem>>, vector<32x32xf32>
    %16 = arith.truncf %15 : vector<32x32xf32> to vector<32x32xbf16>
    %cst_15 = arith.constant dense<0.000000e+00> : vector<16x32xf32>
    %17 = tpu.matmul %8, %16, %cst_15 {dimension_numbers = #tpu.dot_dimension_numbers<[1], [0], [0], [1], [0, 0, 1, 1], [], []>} : vector<16x32xbf16>, vector<32x32xbf16>, vector<16x32xf32> -> vector<16x32xf32>
    %18 = vector.shape_cast %11 : vector<16x32xf32> to vector<2x8x32xf32>
    %19 = vector.extract_strided_slice %18 {offsets = [0, 0, 0], sizes = [2, 8, 8], strides = [1, 1, 1]} : vector<2x8x32xf32> to vector<2x8x8xf32>
    %20 = vector.extract_strided_slice %18 {offsets = [0, 0, 8], sizes = [2, 8, 8], strides = [1, 1, 1]} : vector<2x8x32xf32> to vector<2x8x8xf32>
    %21 = vector.extract_strided_slice %18 {offsets = [0, 0, 16], sizes = [2, 8, 8], strides = [1, 1, 1]} : vector<2x8x32xf32> to vector<2x8x8xf32>
    %22 = vector.extract_strided_slice %18 {offsets = [0, 0, 24], sizes = [2, 8, 8], strides = [1, 1, 1]} : vector<2x8x32xf32> to vector<2x8x8xf32>
    %23 = vector.shape_cast %19 : vector<2x8x8xf32> to vector<1x2x8x8xf32>
    %24 = vector.shape_cast %20 : vector<2x8x8xf32> to vector<1x2x8x8xf32>
    %25 = vector.shape_cast %21 : vector<2x8x8xf32> to vector<1x2x8x8xf32>
    %26 = vector.shape_cast %22 : vector<2x8x8xf32> to vector<1x2x8x8xf32>
    %27 = tpu.concatenate %23, %24, %25, %26 in 0 : vector<1x2x8x8xf32>, vector<1x2x8x8xf32>, vector<1x2x8x8xf32>, vector<1x2x8x8xf32> -> vector<4x2x8x8xf32>
    %28 = vector.shape_cast %27 : vector<4x2x8x8xf32> to vector<8x8x8xf32>
    %29 = arith.truncf %28 : vector<8x8x8xf32> to vector<8x8x8xbf16>
    %30 = vector.shape_cast %14 : vector<16x32xf32> to vector<2x8x32xf32>
    %31 = vector.extract_strided_slice %30 {offsets = [0, 0, 0], sizes = [2, 8, 8], strides = [1, 1, 1]} : vector<2x8x32xf32> to vector<2x8x8xf32>
    %32 = vector.extract_strided_slice %30 {offsets = [0, 0, 8], sizes = [2, 8, 8], strides = [1, 1, 1]} : vector<2x8x32xf32> to vector<2x8x8xf32>
    %33 = vector.extract_strided_slice %30 {offsets = [0, 0, 16], sizes = [2, 8, 8], strides = [1, 1, 1]} : vector<2x8x32xf32> to vector<2x8x8xf32>
    %34 = vector.extract_strided_slice %30 {offsets = [0, 0, 24], sizes = [2, 8, 8], strides = [1, 1, 1]} : vector<2x8x32xf32> to vector<2x8x8xf32>
    %35 = vector.shape_cast %31 : vector<2x8x8xf32> to vector<1x2x8x8xf32>
    %36 = vector.shape_cast %32 : vector<2x8x8xf32> to vector<1x2x8x8xf32>
    %37 = vector.shape_cast %33 : vector<2x8x8xf32> to vector<1x2x8x8xf32>
    %38 = vector.shape_cast %34 : vector<2x8x8xf32> to vector<1x2x8x8xf32>
    %39 = tpu.concatenate %35, %36, %37, %38 in 0 : vector<1x2x8x8xf32>, vector<1x2x8x8xf32>, vector<1x2x8x8xf32>, vector<1x2x8x8xf32> -> vector<4x2x8x8xf32>
    %40 = vector.shape_cast %39 : vector<4x2x8x8xf32> to vector<8x8x8xf32>
    %41 = arith.truncf %40 : vector<8x8x8xf32> to vector<8x8x8xbf16>
    %42 = vector.shape_cast %17 : vector<16x32xf32> to vector<2x8x32xf32>
    %43 = vector.extract_strided_slice %42 {offsets = [0, 0, 0], sizes = [2, 8, 8], strides = [1, 1, 1]} : vector<2x8x32xf32> to vector<2x8x8xf32>
    %44 = vector.extract_strided_slice %42 {offsets = [0, 0, 8], sizes = [2, 8, 8], strides = [1, 1, 1]} : vector<2x8x32xf32> to vector<2x8x8xf32>
    %45 = vector.extract_strided_slice %42 {offsets = [0, 0, 16], sizes = [2, 8, 8], strides = [1, 1, 1]} : vector<2x8x32xf32> to vector<2x8x8xf32>
    %46 = vector.extract_strided_slice %42 {offsets = [0, 0, 24], sizes = [2, 8, 8], strides = [1, 1, 1]} : vector<2x8x32xf32> to vector<2x8x8xf32>
    %47 = vector.shape_cast %43 : vector<2x8x8xf32> to vector<1x2x8x8xf32>
    %48 = vector.shape_cast %44 : vector<2x8x8xf32> to vector<1x2x8x8xf32>
    %49 = vector.shape_cast %45 : vector<2x8x8xf32> to vector<1x2x8x8xf32>
    %50 = vector.shape_cast %46 : vector<2x8x8xf32> to vector<1x2x8x8xf32>
    %51 = tpu.concatenate %47, %48, %49, %50 in 0 : vector<1x2x8x8xf32>, vector<1x2x8x8xf32>, vector<1x2x8x8xf32>, vector<1x2x8x8xf32> -> vector<4x2x8x8xf32>
    %52 = vector.shape_cast %51 : vector<4x2x8x8xf32> to vector<8x8x8xf32>
    %53 = arith.truncf %52 : vector<8x8x8xf32> to vector<8x8x8xbf16>
    "tpu.trace_start"() <{level = 10 : i32, message = "bqd,bkd->bqk"}> : () -> ()
    %cst_16 = arith.constant dense<0.000000e+00> : vector<8x8x8xf32>
    %54 = tpu.matmul %29, %41, %cst_16 {dimension_numbers = #tpu.dot_dimension_numbers<[2], [2], [1], [1], [0, 0, 0, 1, 1, 1], [0], [0]>} : vector<8x8x8xbf16>, vector<8x8x8xbf16>, vector<8x8x8xf32> -> vector<8x8x8xf32>
    "tpu.trace_stop"() : () -> ()
    %55 = vector.shape_cast %54 : vector<8x8x8xf32> to vector<4x2x8x8xf32>
    %c0_17 = arith.constant 0 : index
    %c0_18 = arith.constant 0 : index
    %c0_19 = arith.constant 0 : index
    %56 = vector.load %arg4[%c0_17, %c0_18, %c0_19] : memref<2x8x8xf32, #tpu.memory_space<vmem>>, vector<2x8x8xf32>
    %57 = vector.shape_cast %56 : vector<2x8x8xf32> to vector<1x2x8x8xf32>
    %58 = vector.broadcast %57 : vector<1x2x8x8xf32> to vector<4x2x8x8xf32>
    %59 = arith.addf %55, %58 : vector<4x2x8x8xf32>
    %60 = vector.shape_cast %59 : vector<4x2x8x8xf32> to vector<8x8x8xf32>
    %cst_20 = arith.constant dense<0xFF800000> : vector<8x8xf32>
    %61 = vector.multi_reduction <maximumf>, %60, %cst_20 [2] : vector<8x8x8xf32> to vector<8x8xf32>
    %62 = vector.shape_cast %61 : vector<8x8xf32> to vector<8x8x1xf32>
    %63 = vector.broadcast %62 : vector<8x8x1xf32> to vector<8x8x8xf32>
    %64 = arith.subf %60, %63 : vector<8x8x8xf32>
    %65 = math.exp %64 : vector<8x8x8xf32>
    %cst_21 = arith.constant dense<0.000000e+00> : vector<8x8xf32>
    %66 = vector.multi_reduction <add>, %65, %cst_21 [2] : vector<8x8x8xf32> to vector<8x8xf32>
    %67 = vector.shape_cast %66 : vector<8x8xf32> to vector<8x8x1xf32>
    %68 = tpu.reciprocal %67 {approx = true} : vector<8x8x1xf32> -> vector<8x8x1xf32>
    %69 = vector.broadcast %68 : vector<8x8x1xf32> to vector<8x8x8xf32>
    %70 = arith.mulf %65, %69 : vector<8x8x8xf32>
    %71 = arith.truncf %70 : vector<8x8x8xf32> to vector<8x8x8xbf16>
    "tpu.trace_start"() <{level = 10 : i32, message = "bqk,bkd->bqd"}> : () -> ()
    %cst_22 = arith.constant dense<0.000000e+00> : vector<8x8x8xf32>
    %72 = tpu.matmul %71, %53, %cst_22 {dimension_numbers = #tpu.dot_dimension_numbers<[2], [1], [1], [2], [0, 0, 0, 1, 1, 2], [0], [0]>} : vector<8x8x8xbf16>, vector<8x8x8xbf16>, vector<8x8x8xf32> -> vector<8x8x8xf32>
    "tpu.trace_stop"() : () -> ()
    %73 = vector.shape_cast %72 : vector<8x8x8xf32> to vector<4x2x8x8xf32>
    %74 = vector.extract_strided_slice %73 {offsets = [0, 0, 0, 0], sizes = [1, 2, 8, 8], strides = [1, 1, 1, 1]} : vector<4x2x8x8xf32> to vector<1x2x8x8xf32>
    %75 = vector.shape_cast %74 : vector<1x2x8x8xf32> to vector<2x8x8xf32>
    %76 = vector.extract_strided_slice %73 {offsets = [1, 0, 0, 0], sizes = [1, 2, 8, 8], strides = [1, 1, 1, 1]} : vector<4x2x8x8xf32> to vector<1x2x8x8xf32>
    %77 = vector.shape_cast %76 : vector<1x2x8x8xf32> to vector<2x8x8xf32>
    %78 = vector.extract_strided_slice %73 {offsets = [2, 0, 0, 0], sizes = [1, 2, 8, 8], strides = [1, 1, 1, 1]} : vector<4x2x8x8xf32> to vector<1x2x8x8xf32>
    %79 = vector.shape_cast %78 : vector<1x2x8x8xf32> to vector<2x8x8xf32>
    %80 = vector.extract_strided_slice %73 {offsets = [3, 0, 0, 0], sizes = [1, 2, 8, 8], strides = [1, 1, 1, 1]} : vector<4x2x8x8xf32> to vector<1x2x8x8xf32>
    %81 = vector.shape_cast %80 : vector<1x2x8x8xf32> to vector<2x8x8xf32>
    %82 = tpu.concatenate %75, %77, %79, %81 in 2 : vector<2x8x8xf32>, vector<2x8x8xf32>, vector<2x8x8xf32>, vector<2x8x8xf32> -> vector<2x8x32xf32>
    %83 = vector.shape_cast %82 : vector<2x8x32xf32> to vector<16x32xf32>
    %84 = arith.truncf %83 : vector<16x32xf32> to vector<16x32xbf16>
    %c0_23 = arith.constant 0 : index
    %c0_24 = arith.constant 0 : index
    %85 = vector.load %arg8[%c0_23, %c0_24] : memref<32x32xf32, #tpu.memory_space<vmem>>, vector<32x32xf32>
    %86 = arith.truncf %85 : vector<32x32xf32> to vector<32x32xbf16>
    %cst_25 = arith.constant dense<0.000000e+00> : vector<16x32xf32>
    %87 = tpu.matmul %84, %86, %cst_25 {dimension_numbers = #tpu.dot_dimension_numbers<[1], [0], [0], [1], [0, 0, 1, 1], [], []>} : vector<16x32xbf16>, vector<32x32xbf16>, vector<16x32xf32> -> vector<16x32xf32>
    %c0_26 = arith.constant 0 : index
    %c0_27 = arith.constant 0 : index
    %88 = vector.load %arg9[%c0_26, %c0_27] : memref<16x32xf32, #tpu.memory_space<vmem>>, vector<16x32xf32>
    tpu.vector_store %arg9[%c0_26, %c0_27], %87 {strides = array<i32>} : memref<16x32xf32, #tpu.memory_space<vmem>>, vector<16x32xf32>,
    return
  }
  func.func @transform_0(%arg0: i32) -> (i32, i32, i32) {
    %c0_i32 = arith.constant 0 : i32
    %c0_i32_0 = arith.constant 0 : i32
    %c0_i32_1 = arith.constant 0 : i32
    return %arg0, %c0_i32, %c0_i32_0 : i32, i32, i32
  }
  func.func @transform_1(%arg0: i32) -> (i32, i32, i32) {
    %c0_i32 = arith.constant 0 : i32
    %c0_i32_0 = arith.constant 0 : i32
    %c0_i32_1 = arith.constant 0 : i32
    return %arg0, %c0_i32, %c0_i32_0 : i32, i32, i32
  }
  func.func @transform_2(%arg0: i32) -> (i32, i32, i32) {
    %c0_i32 = arith.constant 0 : i32
    %c0_i32_0 = arith.constant 0 : i32
    %c0_i32_1 = arith.constant 0 : i32
    return %arg0, %c0_i32, %c0_i32_0 : i32, i32, i32
  }
  func.func @transform_3(%arg0: i32) -> (i32, i32, i32) {
    %c0_i32 = arith.constant 0 : i32
    %c0_i32_0 = arith.constant 0 : i32
    %c0_i32_1 = arith.constant 0 : i32
    return %arg0, %c0_i32, %c0_i32_0 : i32, i32, i32
  }
  func.func @transform_4(%arg0: i32) -> (i32, i32) {
    %c0_i32 = arith.constant 0 : i32
    %c0_i32_0 = arith.constant 0 : i32
    %c0_i32_1 = arith.constant 0 : i32
    return %c0_i32, %c0_i32_0 : i32, i32
  }
  func.func @transform_5(%arg0: i32) -> (i32, i32) {
    %c0_i32 = arith.constant 0 : i32
    %c0_i32_0 = arith.constant 0 : i32
    %c0_i32_1 = arith.constant 0 : i32
    return %c0_i32, %c0_i32_0 : i32, i32
  }
  func.func @transform_6(%arg0: i32) -> (i32, i32) {
    %c0_i32 = arith.constant 0 : i32
    %c0_i32_0 = arith.constant 0 : i32
    %c0_i32_1 = arith.constant 0 : i32
    return %c0_i32, %c0_i32_0 : i32, i32
  }
  func.func @transform_7(%arg0: i32) -> (i32, i32) {
    %c0_i32 = arith.constant 0 : i32
    %c0_i32_0 = arith.constant 0 : i32
    %c0_i32_1 = arith.constant 0 : i32
    return %c0_i32, %c0_i32_0 : i32, i32
  }
  func.func @transform_8(%arg0: i32) -> (i32, i32) {
    %c0_i32 = arith.constant 0 : i32
    %c0_i32_0 = arith.constant 0 : i32
    return %arg0, %c0_i32 : i32, i32
  }
}

</mosaic_0001>

<bundles_post_ra>
// kernel: tpu_custom_call.1
= control target key start
LH: loop header
LB: loop body
LE: loop exit
PB: predicated region body
PF: predicated region fallthrough
CT: control target
= control target key end

     0   :  { %13 = vsyncpa [#allocation3], 0  ;;  %s1367_s0 = inlined_call_operand.hbm [shape: f32[2,8,32], index: 0, kind: input, shape index: {}]   ;;  %s1368_s1 = inlined_call_operand.hbm [shape: f32[2,8,32], index: 1, kind: input, shape index: {}]   ;;  %s1369_s2 = inlined_call_operand.hbm [shape: f32[2,8,32], index: 2, kind: input, shape index: {}]   ;;  %s1370_s3 = inlined_call_operand.hbm [shape: f32[2,8,8], index: 3, kind: input, shape index: {}]   ;;  %s1371_s4 = inlined_call_operand.hbm [shape: f32[32,32], index: 4, kind: input, shape index: {}]   ;;  %s1372_s5 = inlined_call_operand.hbm [shape: f32[32,32], index: 5, kind: input, shape index: {}]   ;;  %s1373_s6 = inlined_call_operand.hbm [shape: f32[32,32], index: 6, kind: input, shape index: {}]   ;;  %s1374_s7 = inlined_call_operand.hbm [shape: f32[32,32], index: 7, kind: input, shape index: {}]   ;;  %s1375_s8 = inlined_call_operand.hbm [shape: f32[16,32], index: 8, kind: output, shape index: {}]  }
   0x1   :  { %14 = vsyncpa [#allocation6], 0 }
   0x2   :  { %15 = vsyncpa [#allocation9], 0 }
   0x3   :  { %16 = vsyncpa [#allocation12], 0 }
   0x4   :  { %17 = vsyncpa [#allocation15], 0 }
   0x5   :  { %18 = vsyncpa [#allocation4], 0  ;;  %s36_s29 = sshll.u32 %s1368_s1, 4  ;;  %s1143_s30 = smov [#allocation5]   ;;  %s37_s29 = int_to_ptr.hbm [resolvable:$true] %s36_s29 }
   0x6   :  { %s38_s9 = sshll.u32 %s1143_s30, 4  ;;  %s62_s12 = sshll.u32 %s1370_s3, 4  ;;  %s39_s9 = int_to_ptr.vmem [resolvable:$true] %s38_s9  ;;  %s63_s12 = int_to_ptr.hbm [resolvable:$true] %s62_s12 }
   0x7   :  { %s1144_s13 = smov 128   ;;  %s1145_s14 = smov 8  }
   0x8   :  { %44 = dma.hbm_to_vmem [thread:$0]  %s37_s29, 256, %s39_s9, [#allocation6], %s1144_s13, %s1144_s13, %s1145_s14  }
   0x9   :  { %s1146_s15 = smov [#allocation8]   ;;  %s88_s1 = sshll.u32 %s1372_s5, 4  ;;  %s89_s1 = int_to_ptr.hbm [resolvable:$true] %s88_s1 }
   0xa   :  { %s64_s16 = sshll.u32 %s1146_s15, 4  ;;  %s23_s20 = sshll.u32 %s1367_s0, 4  ;;  %s65_s16 = int_to_ptr.vmem [resolvable:$true] %s64_s16  ;;  %s24_s20 = int_to_ptr.hbm [resolvable:$true] %s23_s20 }
   0xb   :  { %70 = dma.hbm_to_vmem [thread:$0]  %s63_s12, 256, %s65_s16, [#allocation9], %s1144_s13, %s1144_s13, %s1145_s14  }
   0xc   :  { %s1147_s21 = smov [#allocation11]   ;;  %s1148_s23 = smov [#allocation2]  }
   0xd   :  { %s90_s22 = sshll.u32 %s1147_s21, 4  ;;  %s25_s5 = sshll.u32 %s1148_s23, 4  ;;  %s91_s22 = int_to_ptr.vmem [resolvable:$true] %s90_s22  ;;  %s26_s5 = int_to_ptr.vmem [resolvable:$true] %s25_s5 }
   0xe   :  { %96 = dma.hbm_to_vmem [thread:$0]  %s89_s1, 512, %s91_s22, [#allocation12], %s1144_s13, %s1144_s13, %s1145_s14  }
   0xf   :  { %s49_s26 = sshll.u32 %s1369_s2, 4  ;;  %s75_s28 = sshll.u32 %s1371_s4, 4  ;;  %s50_s26 = int_to_ptr.hbm [resolvable:$true] %s49_s26  ;;  %s76_s28 = int_to_ptr.hbm [resolvable:$true] %s75_s28 }
  0x10   :  { %31 = dma.hbm_to_vmem [thread:$0]  %s24_s20, 256, %s26_s5, [#allocation3], %s1144_s13, %s1144_s13, %s1145_s14  }
  0x11   :  { %s1149_s29 = smov [#allocation7]   ;;  %s1150_s9 = smov [#allocation10]  }
  0x12   :  { %s51_s30 = sshll.u32 %s1149_s29, 4  ;;  %s77_s2 = sshll.u32 %s1150_s9, 4  ;;  %s52_s30 = int_to_ptr.vmem [resolvable:$true] %s51_s30  ;;  %s78_s2 = int_to_ptr.vmem [resolvable:$true] %s77_s2 }
  0x13   :  { %57 = dma.hbm_to_vmem [thread:$0]  %s50_s26, 256, %s52_s30, [#allocation6], %s1144_s13, %s1144_s13, %s1145_s14  }
  0x14   :  { %s101_s12 = sshll.u32 %s1373_s6, 4  ;;  %s114_s16 = sshll.u32 %s1374_s7, 4  ;;  %s102_s12 = int_to_ptr.hbm [resolvable:$true] %s101_s12  ;;  %s115_s16 = int_to_ptr.hbm [resolvable:$true] %s114_s16 }
  0x15   :  { %83 = dma.hbm_to_vmem [thread:$0]  %s76_s28, 512, %s78_s2, [#allocation9], %s1144_s13, %s1144_s13, %s1145_s14  }
  0x16   :  { %s1151_s17 = smov [#allocation13]   ;;  %s1152_s1 = smov [#allocation14]  }
  0x17   :  { %s103_s18 = sshll.u32 %s1151_s17, 4  ;;  %s116_s6 = sshll.u32 %s1152_s1, 4  ;;  %s104_s18 = int_to_ptr.vmem [resolvable:$true] %s103_s18  ;;  %s117_s6 = int_to_ptr.vmem [resolvable:$true] %s116_s6 }
  0x18   :  { %109 = dma.hbm_to_vmem [thread:$0]  %s102_s12, 512, %s104_s18, [#allocation12], %s1144_s13, %s1144_s13, %s1145_s14  }
  0x19   :  { %122 = dma.hbm_to_vmem [thread:$0]  %s115_s16, 512, %s117_s6, [#allocation15], %s1144_s13, %s1144_s13, %s1145_s14  }
  0x1a   :  { %1131 = dma.done.wait [#allocation3], 256  }
  0x1b   :  { %1132 = vsyncadd [#allocation3], 4294967040 }
  0x1c   :  { %1133 = dma.done.wait [#allocation6], 512  }
  0x1d   :  { %1134 = vsyncadd [#allocation6], 4294966784 }
  0x1e   :  { %1135 = dma.done.wait [#allocation9], 768  }
  0x1f   :  { %1136 = vsyncadd [#allocation9], 4294966528 }
  0x20   :  { %1137 = dma.done.wait [#allocation12], 1024  }
  0x21   :  { %1138 = vsyncadd [#allocation12], 4294966272 }
  0x22   :  { %1139 = dma.done.wait [#allocation15], 512  }
  0x23   :  { %1140 = vsyncadd [#allocation15], 4294966784  ;;  %v167_v0 = vld [vmem:[#allocation10 + $0x10] sm:$0xff]  ;;  %v168_v1 = vld [vmem:[#allocation10 + $0x18] sm:$0xff]  ;;  %vm171_vm0 = vcmask 261120   ;;  %s1153_s7 = smov 120  }
  0x24   :  { %v191_v2 = vld [vmem:[#allocation11 + $0x10] sm:$0xff]  ;;  %v170_v3 = vpack.c.bf16 %v168_v1, %v167_v0  ;;  %v192_v4 = vld [vmem:[#allocation11 + $0x18] sm:$0xff]  ;;  %v165_v5 = vld [vmem:[#allocation10] sm:$0xff]  ;;  %vm319_vm1 = vcmask 64512   ;;  %s1154_s3 = smov 112   ;;  %s1155_s19 = smov 104  }
  0x25   :  { %v166_v6 = vld [vmem:[#allocation10 + $0x8] sm:$0xff]  ;;  %v194_v7 = vpack.c.bf16 %v192_v4, %v191_v2  ;;  %v189_v8 = vld [vmem:[#allocation11] sm:$0xff]  ;;  %v159_v14 = vld [vmem:[#allocation5] sm:$0xff]  ;;  %vm581_vm2 = vcmask 1043456   ;;  %s1156_s20 = smov 16   ;;  %s1157_s21 = smov 24  }
  0x26   :  { %v190_v9 = vld [vmem:[#allocation11 + $0x8] sm:$0xff]  ;;  %181 = vmatpush.bf16.msra.mxu0 %v170_v3  ;;  %v169_v10 = vpack.c.bf16 %v166_v6, %v165_v5  ;;  %v156_v11 = vld [vmem:[#allocation2] sm:$0xff]  ;;  %v160_v15 = vld [vmem:[#allocation5 + $0x8] sm:$0xff]  ;;  %vm757_vm3 = vcmask 130048   ;;  %vm760_vm4 = vcmask 195584   ;;  %s1158_s22 = smov [#allocation16]  }
  0x27   :  { %v157_v12 = vld [vmem:[#allocation2 + $0x8] sm:$0xff]  ;;  %204 = vmatpush.bf16.msra.mxu1 %v194_v7  ;;  %v193_v13 = vpack.c.bf16 %v190_v9, %v189_v8  ;;  %v161_v17 = vpack.c.bf16 %v160_v15, %v159_v14  ;;  %v214_v30 = vld [vmem:[#allocation13 + $0x10] sm:$0xff]  ;;  %v215_v31 = vld [vmem:[#allocation13 + $0x18] sm:$0xff]  ;;  %s793_s23 = sshll.u32 %s1158_s22, 4  ;;  %s795_s25 = sshll.u32 %s1375_s8, 4  ;;  %s794_s23 = int_to_ptr.vmem [resolvable:$true] %s793_s23  ;;  %s796_s25 = int_to_ptr.hbm [resolvable:$true] %s795_s25 }
  0x28   :  { %v158_v16 = vpack.c.bf16 %v157_v12, %v156_v11  ;;  %v217_v32 = vpack.c.bf16 %v215_v31, %v214_v30  ;;  %v212_v33 = vld [vmem:[#allocation13] sm:$0xff]  ;;  %v213_v34 = vld [vmem:[#allocation13 + $0x8] sm:$0xff]  ;;  %v472_v2 = vld [vmem:[#allocation8] sm:$0xff] }
  0x29   :  { %v216_v35 = vpack.c.bf16 %v213_v34, %v212_v33  ;;  %v162_v36 = vld [vmem:[#allocation7] sm:$0xff]  ;;  %v163_v37 = vld [vmem:[#allocation7 + $0x8] sm:$0xff]  ;;  %v473_v5 = vld [vmem:[#allocation8 + $0x8] sm:$0xff] }
  0x2a   :  { %182 = vmatpush.bf16.msra.mxu0 %v169_v10  ;;  %227 = vmatpush.bf16.msra.mxu2 %v217_v32  ;;  %v164_v38 = vpack.c.bf16 %v163_v37, %v162_v36 }
  0x2b   :  { %205 = vmatpush.bf16.msra.mxu1 %v193_v13 }
  0x2d   :  { %812 = vmatmul.msk.bf16.vlgmr.msra.gmra.mxu0 %vm171_vm0, %v158_v16 }
  0x2e   :  { %813 = vmatmul.msk.bf16.vlgmr.msra.gmra.mxu1 %vm171_vm0, %v161_v17  ;;  %228 = vmatpush.bf16.msra.mxu2 %v216_v35 }
  0x31   :  { %814 = vmatmul.msk.bf16.vlgmr.msra.gmra.mxu2 %vm171_vm0, %v164_v38 }
  0xaa   :  { %v184_v18 = vpop.f32.mrf.mxu0 }
  0xab   :  { %v207_v19 = vpop.f32.mrf.mxu1  ;;  %237 = vrot.lane.b32.xlu2 %v184_v18, %s1153_s7  ;;  %v255_v24 = vpack.c.bf16 %v184_v18, %v184_v18 }
  0xac   :  { %271 = vrot.lane.b32.xlu1 %v207_v19, %s1154_s3  ;;  %v283_v20 = vpack.c.bf16 %v207_v19, %v207_v19 }
  0xae   :  { %v324_v21 = vsel %vm319_vm1, %v283_v20, 0 }
  0xaf   :  { %333 = vmatpush.bf16.xpose.msra.mxu3 %v324_v21 }
  0xb2   :  { %v186_v27 = vpop.f32.mrf.mxu0 }
  0xb3   :  { %v209_v22 = vpop.f32.mrf.mxu1  ;;  %v848_v28 = vpack.i.bf16 %v207_v19, %v186_v27  ;;  %v256_v29 = vpack.c.bf16 %v186_v27, %v186_v27 }
  0xb4   :  { %279 = vrot.lane.b32.xlu1 %v209_v22, %s1155_s19  ;;  %267 = vrot.lane.b32.xlu0 %v209_v22, %s1153_s7  ;;  %v853_v23 = vpack.i.bf16 %v209_v22, %v184_v18  ;;  %v284_v25 = vpack.c.bf16 %v209_v22, %v209_v22  ;;  %v1283_v17 = vpop.f32.mrf.mxu2 }
  0xb6   :  { %854 = vrot.lane.b32.xlu2 %v853_v23, %s1154_s3  ;;  %815 = vmatmul.msk.bf16.vlgmr.msra.gmra.mxu3 %vm319_vm1, %v255_v24  ;;  %v343_v26 = vsel %vm319_vm1, %v284_v25, 0 }
  0xb7   :  { %352 = vmatpush.bf16.xpose.msrb.mxu0 %v343_v26 }
  0xbc   :  { %277 = vrot.lane.b32.xlu1 %v207_v19, %s1155_s19  ;;  %849 = vrot.lane.b32.xlu0 %v848_v28, %s1153_s7  ;;  %v311_v19 = vpack.c.bf16 %v1283_v17, %v1283_v17 }
  0xbe   :  { %245 = vrot.lane.b32.xlu2 %v186_v27, %s1154_s3  ;;  %816 = vmatmul.msk.bf16.vlgmr.msrb.gmra.mxu0 %vm319_vm1, %v256_v29  ;;  %v583_v21 = vsel %vm581_vm2, %v311_v19, 0 }
  0xc4   :  { %251 = vrot.lane.b32.xlu0 %v186_v27, %s1155_s19 }
  0xcc   :  { %249 = vrot.lane.b32.xlu0 %v184_v18, %s1155_s19  ;;  %v1285_v18 = vpop.f32.mrf.mxu2 }
  0xcd   :  { %v312_v20 = vpack.c.bf16 %v1285_v18, %v1285_v18 }
  0xcf   :  { %v602_v22 = vsel %vm581_vm2, %v312_v20, 0 }
 0x105   :  { %v238_v39 = vpop.permute.xlu2 %237 }
 0x106   :  { %v257_v3 = vpack.c.bf16 %v238_v39, %v238_v39 }
 0x110   :  { %v855_v40 = vpop.permute.xlu2 %854 }
 0x111   :  { %v857_v41 = vunpack.i.h.bf16 %v855_v40  ;;  %v856_v49 = vunpack.i.l.bf16 %v855_v40 }
 0x113   :  { %v288_v42 = vpack.c.bf16 %v857_v41, %v857_v41  ;;  %v259_v52 = vpack.c.bf16 %v856_v49, %v856_v49 }
 0x115   :  { %v419_v43 = vsel %vm319_vm1, %v288_v42, 0 }
 0x116   :  { %428 = vmatpush.bf16.xpose.msra.mxu0 %v419_v43 }
 0x118   :  { %v246_v44 = vpop.permute.xlu2 %245 }
 0x119   :  { %v260_v45 = vpack.c.bf16 %v246_v44, %v246_v44 }
 0x11d   :  { %820 = vmatmul.msk.bf16.vlgmr.msra.gmra.mxu0 %vm319_vm1, %v260_v45 }
 0x11e   :  { %v272_v46 = vpop.permute.xlu1 %271  ;;  %611 = vmatpush.bf16.msrb.mxu0 %v602_v22 }
 0x11f   :  { %v287_v47 = vpack.c.bf16 %v272_v46, %v272_v46 }
 0x121   :  { %v400_v48 = vsel %vm319_vm1, %v287_v47, 0 }
 0x122   :  { %409 = vmatpush.bf16.xpose.msrb.mxu3 %v400_v48 }
 0x126   :  { %v280_v50 = vpop.permute.xlu1 %279  ;;  %v268_v51 = vpop.permute.xlu0 %267 }
 0x127   :  { %v290_v53 = vpack.c.bf16 %v280_v50, %v280_v50  ;;  %v286_v54 = vpack.c.bf16 %v268_v51, %v268_v51 }
 0x129   :  { %v457_v55 = vsel %vm319_vm1, %v290_v53, 0  ;;  %819 = vmatmul.msk.bf16.vlgmr.msrb.gmra.mxu3 %vm319_vm1, %v259_v52  ;;  %v381_v56 = vsel %vm319_vm1, %v286_v54, 0 }
 0x12a   :  { %390 = vmatpush.bf16.xpose.msrb.mxu2 %v381_v56  ;;  %592 = vmatpush.bf16.msra.mxu3 %v583_v21 }
 0x12e   :  { %v278_v57 = vpop.permute.xlu1 %277  ;;  %v850_v58 = vpop.permute.xlu0 %849 }
 0x12f   :  { %v852_v59 = vunpack.i.h.bf16 %v850_v58  ;;  %v851_v60 = vunpack.i.l.bf16 %v850_v58  ;;  %v289_v61 = vpack.c.bf16 %v278_v57, %v278_v57  ;;  %v858_v57 = vpack.i.bf16 %v1283_v17, %v1285_v18 }
 0x131   :  { %v285_v62 = vpack.c.bf16 %v852_v59, %v852_v59  ;;  %v258_v63 = vpack.c.bf16 %v851_v60, %v851_v60  ;;  %v438_v1 = vsel %vm319_vm1, %v289_v61, 0 }
 0x132   :  { %466 = vmatpush.bf16.xpose.msra.mxu2 %v457_v55 }
 0x133   :  { %818 = vmatmul.msk.bf16.vlgmr.msrb.gmra.mxu2 %vm319_vm1, %v258_v63  ;;  %v362_v0 = vsel %vm319_vm1, %v285_v62, 0 }
 0x134   :  { %371 = vmatpush.bf16.xpose.msrb.mxu1 %v362_v0 }
 0x136   :  { %v252_v8 = vpop.permute.xlu0 %251 }
 0x137   :  { %v262_v12 = vpack.c.bf16 %v252_v8, %v252_v8 }
 0x139   :  { %v335_v4 = vpop.f32.mrf.mxu3 }
 0x13a   :  { %v474_v6 = vadd.f32 %v472_v2, %v335_v4 }
 0x13b   :  { %v354_v7 = vpop.f32.mrf.mxu0  ;;  %817 = vmatmul.msk.bf16.vlgmr.msrb.gmra.mxu1 %vm319_vm1, %v257_v3 }
 0x13c   :  { %447 = vmatpush.bf16.xpose.msra.mxu1 %v438_v1  ;;  %v475_v9 = vadd.f32 %v473_v5, %v354_v7  ;;  %v482_v10 = vsel %vm319_vm1, %v474_v6, -inf }
 0x13d   :  { %483 = vmax.xlane.f32.xlu1 %v482_v10 }
 0x13e   :  { %v485_v11 = vsel %vm319_vm1, %v475_v9, -inf  ;;  %v250_v15 = vpop.permute.xlu0 %249 }
 0x13f   :  { %486 = vmax.xlane.f32.xlu0 %v485_v11  ;;  %v261_v16 = vpack.c.bf16 %v250_v15, %v250_v15  ;;  %v863_v15 = vpack.i.bf16 %v1285_v18, %v1283_v17 }
 0x141   :  { %v337_v13 = vpop.f32.mrf.mxu3 }
 0x143   :  { %v356_v14 = vpop.f32.mrf.mxu0  ;;  %822 = vmatmul.msk.bf16.vlgmr.msra.gmra.mxu2 %vm319_vm1, %v262_v12 }
 0x14b   :  { %821 = vmatmul.msk.bf16.vlgmr.msra.gmra.mxu1 %vm319_vm1, %v261_v16 }
 0x19a   :  { %v430_v23 = vpop.f32.mrf.mxu0 }
 0x19b   :  { %v1293_v24 = vadd.f32 %v473_v5, %v430_v23 }
 0x19d   :  { %v497_v25 = vsel %vm319_vm1, %v1293_v24, -inf }
 0x19e   :  { %498 = vmax.xlane.f32.xlu0 %v497_v25 }
 0x1a2   :  { %v432_v26 = vpop.f32.mrf.mxu0 }
 0x1ac   :  { %v411_v27 = vpop.f32.mrf.mxu3 }
 0x1ad   :  { %v478_v28 = vadd.f32 %v472_v2, %v411_v27 }
 0x1af   :  { %v494_v29 = vsel %vm319_vm1, %v478_v28, -inf }
 0x1b0   :  { %495 = vmax.xlane.f32.xlu1 %v494_v29  ;;  %v484_v35 = vpop.xlane.xlu1 %483 }
 0x1b1   :  { %v506_v39 = vsub.f32 %v474_v6, %v484_v35 }
 0x1b2   :  { %v487_v38 = vpop.xlane.xlu0 %486 }
 0x1b3   :  { %v507_v42 = vsub.f32 %v475_v9, %v487_v38  ;;  %v514_v43 = vmul.f32 1.442695, %v506_v39 }
 0x1b4   :  { %v413_v30 = vpop.f32.mrf.mxu3 }
 0x1b5   :  { %v516_v44 = vmul.f32 1.442695, %v507_v42  ;;  %883 = vpow2.f32 %v514_v43 }
 0x1b6   :  { %v392_v31 = vpop.f32.mrf.mxu2 }
 0x1b7   :  { %v477_v32 = vadd.f32 %v473_v5, %v392_v31  ;;  %885 = vpow2.f32 %v516_v44 }
 0x1b8   :  { %v373_v33 = vpop.f32.mrf.mxu1 }
 0x1b9   :  { %v491_v34 = vsel %vm319_vm1, %v477_v32, -inf  ;;  %v476_v36 = vadd.f32 %v472_v2, %v373_v33 }
 0x1ba   :  { %492 = vmax.xlane.f32.xlu2 %v491_v34 }
 0x1bb   :  { %v488_v41 = vsel %vm319_vm1, %v476_v36, -inf  ;;  %v884_v51 = vpop.eup %883 }
 0x1bc   :  { %v530_v55 = vsel %vm319_vm1, %v884_v51, 0.0 }
 0x1bd   :  { %v886_v53 = vpop.eup %885 }
 0x1be   :  { %v394_v37 = vpop.f32.mrf.mxu2  ;;  %v533_v56 = vsel %vm319_vm1, %v886_v53, 0.0 }
 0x1c0   :  { %v375_v40 = vpop.f32.mrf.mxu1 }
 0x1c2   :  { %489 = vmax.xlane.f32.xlu2 %v488_v41 }
 0x1c6   :  { %v468_v45 = vpop.f32.mrf.mxu2 }
 0x1c7   :  { %v481_v46 = vadd.f32 %v473_v5, %v468_v45 }
 0x1c8   :  { %v449_v47 = vpop.f32.mrf.mxu1 }
 0x1c9   :  { %v1300_v48 = vadd.f32 %v472_v2, %v449_v47  ;;  %v503_v49 = vsel %vm319_vm1, %v481_v46, -inf }
 0x1ca   :  { %504 = vmax.xlane.f32.xlu2 %v503_v49 }
 0x1cb   :  { %v500_v50 = vsel %vm319_vm1, %v1300_v48, -inf }
 0x1cc   :  { %501 = vmax.xlane.f32.xlu1 %v500_v50 }
 0x1ce   :  { %v470_v52 = vpop.f32.mrf.mxu2 }
 0x1d0   :  { %v451_v54 = vpop.f32.mrf.mxu1 }
 0x1d2   :  { %531 = vadd.xlane.f32.xlu2 %v530_v55 }
 0x1d4   :  { %534 = vadd.xlane.f32.xlu1 %v533_v56 }
 0x1ea   :  { %859 = vrot.lane.b32.xlu2 %v858_v57, %s1153_s7 }
 0x1f2   :  { %307 = vrot.lane.b32.xlu2 %v1285_v18, %s1155_s19 }
 0x1fa   :  { %305 = vrot.lane.b32.xlu2 %v1283_v17, %s1155_s19 }
 0x211   :  { %v499_v4 = vpop.xlane.xlu0 %498 }
 0x212   :  { %v511_v7 = vsub.f32 %v1293_v24, %v499_v4 }
 0x214   :  { %v524_v11 = vmul.f32 1.442695, %v511_v7 }
 0x223   :  { %v496_v58 = vpop.xlane.xlu1 %495 }
 0x224   :  { %v510_v59 = vsub.f32 %v478_v28, %v496_v58 }
 0x226   :  { %v522_v60 = vmul.f32 1.442695, %v510_v59 }
 0x228   :  { %887 = vpow2.f32 %v522_v60 }
 0x22d   :  { %v493_v61 = vpop.xlane.xlu2 %492 }
 0x22e   :  { %v1314_v62 = vpop.eup %887  ;;  %v509_v2 = vsub.f32 %v477_v32, %v493_v61 }
 0x22f   :  { %v542_v63 = vsel %vm319_vm1, %v1314_v62, 0.0 }
 0x230   :  { %543 = vadd.xlane.f32.xlu1 %v542_v63  ;;  %v520_v5 = vmul.f32 1.442695, %v509_v2 }
 0x235   :  { %v490_v0 = vpop.xlane.xlu2 %489 }
 0x236   :  { %v508_v1 = vsub.f32 %v476_v36, %v490_v0 }
 0x238   :  { %v518_v3 = vmul.f32 1.442695, %v508_v1 }
 0x23a   :  { %889 = vpow2.f32 %v518_v3 }
 0x23b   :  { %891 = vpow2.f32 %v520_v5 }
 0x23d   :  { %v505_v6 = vpop.xlane.xlu2 %504 }
 0x23e   :  { %v513_v16 = vsub.f32 %v481_v46, %v505_v6 }
 0x23f   :  { %v502_v8 = vpop.xlane.xlu1 %501 }
 0x240   :  { %v1319_v9 = vpop.eup %889  ;;  %v528_v21 = vmul.f32 1.442695, %v513_v16  ;;  %v512_v17 = vsub.f32 %v1300_v48, %v502_v8 }
 0x241   :  { %v536_v10 = vsel %vm319_vm1, %v1319_v9, 0.0  ;;  %v1323_v13 = vpop.eup %891 }
 0x242   :  { %537 = vadd.xlane.f32.xlu0 %v536_v10  ;;  %v539_v19 = vsel %vm319_vm1, %v1323_v13, 0.0  ;;  %v526_v35 = vmul.f32 1.442695, %v512_v17 }
 0x245   :  { %v532_v12 = vpop.xlane.xlu2 %531 }
 0x246   :  { %893 = vrcp.f32 %v532_v12 }
 0x247   :  { %895 = vpow2.f32 %v524_v11  ;;  %v535_v14 = vpop.xlane.xlu1 %534 }
 0x248   :  { %897 = vrcp.f32 %v535_v14 }
 0x249   :  { %864 = vrot.lane.b32.xlu1 %v863_v15, %s1154_s3  ;;  %899 = vpow2.f32 %v528_v21 }
 0x24a   :  { %540 = vadd.xlane.f32.xlu0 %v539_v19  ;;  %901 = vpow2.f32 %v526_v35  ;;  %v764_v35 = vld [vmem:[#allocation14] sm:$0xff] }
 0x24c   :  { %v894_v20 = vpop.eup %893 }
 0x24d   :  { %v1330_v22 = vpop.eup %895  ;;  %v562_v23 = vmul.f32 %v894_v20, %v884_v51  ;;  %v860_v24 = vpop.permute.xlu2 %859 }
 0x24e   :  { %v898_v25 = vpop.eup %897  ;;  %v862_v26 = vunpack.i.h.bf16 %v860_v24  ;;  %v861_v27 = vunpack.i.l.bf16 %v860_v24  ;;  %v545_v32 = vsel %vm319_vm1, %v1330_v22, 0.0 }
 0x24f   :  { %v570_v28 = vpack.c.bf16 %v562_v23, %v562_v23  ;;  %v563_v29 = vmul.f32 %v898_v25, %v886_v53  ;;  %v900_v37 = vpop.eup %899 }
 0x250   :  { %v313_v18 = vpack.c.bf16 %v862_v26, %v862_v26  ;;  %v314_v30 = vpack.c.bf16 %v861_v27, %v861_v27  ;;  %v551_v40 = vsel %vm319_vm1, %v900_v37, 0.0  ;;  %v902_v42 = vpop.eup %901 }
 0x251   :  { %v571_v31 = vpack.c.bf16 %v563_v29, %v563_v29  ;;  %823 = vmatmul.msk.bf16.vlgmr.msra.gmra.mxu3 %vm319_vm1, %v570_v28  ;;  %v548_v45 = vsel %vm319_vm1, %v902_v42, 0.0 }
 0x252   :  { %546 = vadd.xlane.f32.xlu0 %v545_v32  ;;  %v621_v33 = vsel %vm581_vm2, %v313_v18, 0  ;;  %v640_v34 = vsel %vm581_vm2, %v314_v30, 0  ;;  %v766_v32 = vld [vmem:[#allocation14 + $0x10] sm:$0xff] }
 0x253   :  { %824 = vmatmul.msk.bf16.vlgmr.msrb.gmra.mxu0 %vm319_vm1, %v571_v31  ;;  %630 = vmatpush.bf16.msrb.mxu1 %v621_v33  ;;  %v767_v33 = vld [vmem:[#allocation14 + $0x18] sm:$0xff] }
 0x254   :  { %649 = vmatpush.bf16.msrb.mxu2 %v640_v34  ;;  %v769_v34 = vpack.c.bf16 %v767_v33, %v766_v32 }
 0x255   :  { %v308_v36 = vpop.permute.xlu2 %307 }
 0x256   :  { %v318_v38 = vpack.c.bf16 %v308_v36, %v308_v36  ;;  %v765_v36 = vld [vmem:[#allocation14 + $0x8] sm:$0xff] }
 0x258   :  { %v716_v39 = vsel %vm581_vm2, %v318_v38, 0 }
 0x259   :  { %725 = vmatpush.bf16.msra.mxu2 %v716_v39 }
 0x25a   :  { %552 = vadd.xlane.f32.xlu0 %v551_v40 }
 0x25d   :  { %v306_v41 = vpop.permute.xlu2 %305 }
 0x25e   :  { %v317_v43 = vpack.c.bf16 %v306_v41, %v306_v41 }
 0x260   :  { %v697_v44 = vsel %vm581_vm2, %v317_v43, 0 }
 0x261   :  { %706 = vmatpush.bf16.msra.mxu1 %v697_v44 }
 0x262   :  { %549 = vadd.xlane.f32.xlu0 %v548_v45 }
 0x2a3   :  { %v544_v46 = vpop.xlane.xlu1 %543 }
 0x2a4   :  { %903 = vrcp.f32 %v544_v46 }
 0x2aa   :  { %v904_v48 = vpop.eup %903 }
 0x2ab   :  { %v566_v55 = vmul.f32 %v904_v48, %v1314_v62 }
 0x2ad   :  { %v574_v61 = vpack.c.bf16 %v566_v55, %v566_v55 }
 0x2b5   :  { %v538_v47 = vpop.xlane.xlu0 %537 }
 0x2b6   :  { %905 = vrcp.f32 %v538_v47 }
 0x2bb   :  { %v865_v49 = vpop.permute.xlu1 %864 }
 0x2bc   :  { %v906_v50 = vpop.eup %905  ;;  %v867_v51 = vunpack.i.h.bf16 %v865_v49  ;;  %v866_v52 = vunpack.i.l.bf16 %v865_v49 }
 0x2bd   :  { %v564_v53 = vmul.f32 %v906_v50, %v1319_v9  ;;  %v541_v54 = vpop.xlane.xlu0 %540 }
 0x2be   :  { %v316_v56 = vpack.c.bf16 %v867_v51, %v867_v51  ;;  %v315_v57 = vpack.c.bf16 %v866_v52, %v866_v52  ;;  %907 = vrcp.f32 %v541_v54 }
 0x2bf   :  { %v572_v58 = vpack.c.bf16 %v564_v53, %v564_v53 }
 0x2c0   :  { %v659_v59 = vsel %vm581_vm2, %v315_v57, 0  ;;  %v678_v60 = vsel %vm581_vm2, %v316_v56, 0 }
 0x2c1   :  { %825 = vmatmul.msk.bf16.vlgmr.msrb.gmra.mxu1 %vm319_vm1, %v572_v58  ;;  %668 = vmatpush.bf16.msrb.mxu3 %v659_v59 }
 0x2c2   :  { %687 = vmatpush.bf16.msra.mxu0 %v678_v60 }
 0x2c4   :  { %v908_v63 = vpop.eup %907  ;;  %827 = vmatmul.msk.bf16.vlgmr.msrb.gmra.mxu3 %vm319_vm1, %v574_v61 }
 0x2c5   :  { %v565_v0 = vmul.f32 %v908_v63, %v1323_v13  ;;  %v547_v1 = vpop.xlane.xlu0 %546  ;;  %779 = vmatpush.bf16.msra.mxu3 %v769_v34 }
 0x2c6   :  { %909 = vrcp.f32 %v547_v1 }
 0x2c7   :  { %v573_v62 = vpack.c.bf16 %v565_v0, %v565_v0 }
 0x2c9   :  { %826 = vmatmul.msk.bf16.vlgmr.msrb.gmra.mxu2 %vm319_vm1, %v573_v62 }
 0x2cc   :  { %v910_v2 = vpop.eup %909 }
 0x2cd   :  { %v567_v3 = vmul.f32 %v910_v2, %v1330_v22  ;;  %v553_v4 = vpop.xlane.xlu0 %552 }
 0x2ce   :  { %911 = vrcp.f32 %v553_v4 }
 0x2cf   :  { %v575_v5 = vpack.c.bf16 %v567_v3, %v567_v3 }
 0x2d0   :  { %v613_v6 = vpop.f32.mrf.mxu0 }
 0x2d1   :  { %828 = vmatmul.msk.bf16.vlgmr.msra.gmra.mxu0 %vm319_vm1, %v575_v5 }
 0x2d4   :  { %v912_v7 = vpop.eup %911  ;;  %v594_v8 = vpop.f32.mrf.mxu3 }
 0x2d5   :  { %v569_v9 = vmul.f32 %v912_v7, %v900_v37  ;;  %v550_v10 = vpop.xlane.xlu0 %549  ;;  %v768_v37 = vpack.c.bf16 %v765_v36, %v764_v35 }
 0x2d6   :  { %913 = vrcp.f32 %v550_v10 }
 0x2d7   :  { %v577_v11 = vpack.c.bf16 %v569_v9, %v569_v9  ;;  %780 = vmatpush.bf16.msra.mxu3 %v768_v37 }
 0x2d8   :  { %v615_v12 = vpop.f32.mrf.mxu0 }
 0x2d9   :  { %830 = vmatmul.msk.bf16.vlgmr.msra.gmra.mxu2 %vm319_vm1, %v577_v11 }
 0x2dc   :  { %v914_v13 = vpop.eup %913  ;;  %v596_v14 = vpop.f32.mrf.mxu3 }
 0x2dd   :  { %v568_v15 = vmul.f32 %v914_v13, %v902_v42 }
 0x2df   :  { %v576_v16 = vpack.c.bf16 %v568_v15, %v568_v15 }
 0x2e1   :  { %829 = vmatmul.msk.bf16.vlgmr.msra.gmra.mxu1 %vm319_vm1, %v576_v16 }
 0x33e   :  { %v632_v19 = vpop.f32.mrf.mxu1 }
 0x346   :  { %v634_v20 = vpop.f32.mrf.mxu1 }
 0x347   :  { %v670_v21 = vpop.f32.mrf.mxu3 }
 0x34c   :  { %v651_v22 = vpop.f32.mrf.mxu2 }
 0x34d   :  { %v868_v23 = vpack.i.bf16 %v651_v22, %v632_v19 }
 0x34e   :  { %v689_v24 = vpop.f32.mrf.mxu0 }
 0x34f   :  { %v873_v25 = vpack.i.bf16 %v689_v24, %v670_v21  ;;  %v672_v26 = vpop.f32.mrf.mxu3  ;;  %869 = vrot.lane.b32.xlu0 %v868_v23, %s1145_s14 }
 0x351   :  { %874 = vrot.lane.b32.xlu1 %v873_v25, %s1156_s20 }
 0x354   :  { %v653_v27 = vpop.f32.mrf.mxu2 }
 0x356   :  { %v691_v28 = vpop.f32.mrf.mxu0 }
 0x35c   :  { %v727_v29 = vpop.f32.mrf.mxu2 }
 0x35e   :  { %v708_v17 = vpop.f32.mrf.mxu1 }
 0x35f   :  { %v878_v18 = vpack.i.bf16 %v727_v29, %v708_v17 }
 0x361   :  { %879 = vrot.lane.b32.xlu2 %v878_v18, %s1157_s21 }
 0x364   :  { %v729_v30 = vpop.f32.mrf.mxu2 }
 0x366   :  { %v710_v31 = vpop.f32.mrf.mxu1 }
 0x3bb   :  { %v880_v39 = vpop.permute.xlu2 %879 }
 0x3bc   :  { %v882_v47 = vunpack.i.h.bf16 %v880_v39  ;;  %v881_v48 = vunpack.i.l.bf16 %v880_v39 }
 0x3c1   :  { %v870_v38 = vpop.permute.xlu0 %869 }
 0x3c2   :  { %v872_v40 = vunpack.i.h.bf16 %v870_v38  ;;  %v871_v41 = vunpack.i.l.bf16 %v870_v38 }
 0x3c3   :  { %v875_v42 = vpop.permute.xlu1 %874 }
 0x3c4   :  { %v755_v43 = vsel %vm319_vm1, %v594_v8, %v871_v41  ;;  %v756_v44 = vsel %vm319_vm1, %v613_v6, %v872_v40  ;;  %v877_v45 = vunpack.i.h.bf16 %v875_v42  ;;  %v876_v46 = vunpack.i.l.bf16 %v875_v42 }
 0x3c6   :  { %v759_v49 = vsel %vm757_vm3, %v756_v44, %v877_v45  ;;  %v758_v50 = vsel %vm757_vm3, %v755_v43, %v876_v46 }
 0x3c7   :  { %v762_v51 = vsel %vm760_vm4, %v759_v49, %v882_v47  ;;  %v761_v52 = vsel %vm760_vm4, %v758_v50, %v881_v48 }
 0x3c8   :  { %v763_v53 = vpack.c.bf16 %v762_v51, %v761_v52 }
 0x3ca   :  { %831 = vmatmul.msk.bf16.vlgmr.msra.gmra.mxu3 %vm171_vm0, %v763_v53 }
 0x44d   :  { %v782_v54 = vpop.f32.mrf.mxu3 }
 0x44e   :  { %787 = vst.msk [vmem:[#allocation16] sm:$0xff] %vm171_vm0, %v782_v54 }
 0x455   :  { %v784_v55 = vpop.f32.mrf.mxu3 }
 0x456   :  { %788 = vst.msk [vmem:[#allocation16 + $0x8] sm:$0xff] %vm171_vm0, %v784_v55 }
 0x457   :  { %801 = dma.vmem_to_hbm [thread:$0]  %s794_s23, 256, %s796_s25, [#allocation4], %s1144_s13, %s1144_s13, %s1145_s14  }
 0x458   :  { %1141 = dma.done.wait [#allocation4], 256  }
 0x459   :  { %1142 = vsyncadd [#allocation4], 4294967040 }
 0x45a   :  { %806 = vsyncpa [#allocation3], 1 }
 0x45b   :  { %807 = vsyncpa [#allocation6], 1 }
 0x45c   :  { %808 = vsyncpa [#allocation9], 1 }
 0x45d   :  { %809 = vsyncpa [#allocation12], 1 }
 0x45e   :  { %810 = vsyncpa [#allocation15], 1 }
 0x45f   :  { %811 = vsyncpa [#allocation4], 1 }

</bundles_post_ra>
